<compile_context>
chip_gen: v6e
topology: v6e:2x2x1
jax: 0.10.0
libtpu: 0.0.40
codegen_flags: <defaults>
</compile_context>

<pallas_src>
import functools

import jax
import jax.numpy as jnp
from jax.experimental import pallas as pl
from jax.experimental.pallas import tpu as pltpu


# ----------------------------------------------------------------------------
# Fused kernel: one batch element per grid step.
#   qkv = x @ Wqkv                (one lane-dense MXU call, N = 3*H*hs)
#   per head h: s = q_h k_h^T / sqrt(hs); causal mask; softmax (f32)
#               y += softmax(s) @ v_h @ Wp_h        (projection-accumulate)
#   out = y + b
# ----------------------------------------------------------------------------
def _mha_fused_kernel(x_ref, wqkv_ref, wp_ref, bp_ref, o_ref, *,
                      num_heads, head_size):
    H, hs = num_heads, head_size
    Dh = H * hs
    T = x_ref.shape[1]

    x = x_ref[0].astype(jnp.bfloat16)     # (T, C)   bf16 MXU operand
    wqkv = wqkv_ref[...]                  # (C, 3*Dh) bf16, pre-transposed
    wp = wp_ref[...]                      # (Dh, Dout) bf16, pre-transposed
    bp = bp_ref[...]                      # (1, Dout) f32

    # Fused QKV projection for all heads; f32 accumulation.
    qkv = jnp.dot(x, wqkv, preferred_element_type=jnp.float32)   # (T, 3*Dh)

    # Causal mask built once, shared by all heads.
    row = jax.lax.broadcasted_iota(jnp.int32, (T, T), 0)
    col = jax.lax.broadcasted_iota(jnp.int32, (T, T), 1)
    causal = row >= col
    scale = jnp.float32(hs ** -0.5)

    Dout = wp.shape[-1]
    acc = jnp.zeros((T, Dout), jnp.float32)

    for h in range(H):                    # H is small & static -> unrolled
        q = qkv[:, h * hs:(h + 1) * hs].astype(jnp.bfloat16)            # (T, hs)
        k = qkv[:, Dh + h * hs:Dh + (h + 1) * hs].astype(jnp.bfloat16)  # (T, hs)
        v = qkv[:, 2 * Dh + h * hs:2 * Dh + (h + 1) * hs].astype(jnp.bfloat16)

        # q @ k^T without materializing k.T: contract the hs axis of both.
        s = jax.lax.dot_general(
            q, k, (((1,), (1,)), ((), ())),
            preferred_element_type=jnp.float32) * scale                 # (T, T)
        s = jnp.where(causal, s, -jnp.inf)

        # Numerically stable softmax in f32 (VPU + EUP).
        m = jnp.max(s, axis=-1, keepdims=True)
        e = jnp.exp(s - m)
        denom = jnp.sum(e, axis=-1, keepdims=True)
        wei = e * pl.reciprocal(denom, approx=True)

        head_out = jnp.dot(wei.astype(jnp.bfloat16), v,
                           preferred_element_type=jnp.float32)          # (T, hs)

        # Projection-accumulate: equivalent to concat(head_outs) @ Wp^T but
        # keeps the store lane-dense (Dout) and avoids a concat relayout.
        acc = acc + jnp.dot(head_out.astype(jnp.bfloat16),
                            wp[h * hs:(h + 1) * hs, :],
                            preferred_element_type=jnp.float32)

    o_ref[0] = (acc + bp).astype(o_ref.dtype)


# ----------------------------------------------------------------------------
# Wrapper: host-side weight prep + single pallas_call.
# ----------------------------------------------------------------------------
def multi_head_attention(x, params):
    """x: (B, T, C); wq/wk/wv: (H, hs, C); wp: (Dout, H*hs); bp: (Dout,)."""
    wq, wk, wv, wp, bp = params
    B, T, C = x.shape
    H, hs, _ = wq.shape
    Dh = H * hs
    Dout = wp.shape[0]

    # One-time host-side layout prep: stack all heads' Q/K/V weights into a
    # single pre-transposed (C, 3*H*hs) operand; pre-transpose the projection
    # weight; cast MXU operands to bf16 (accumulation stays f32 in-kernel).
    wqkv_t = jnp.concatenate(
        [wq.reshape(Dh, C), wk.reshape(Dh, C), wv.reshape(Dh, C)], axis=0
    ).T.astype(jnp.bfloat16)                       # (C, 3*Dh)
    wp_t = wp.T.astype(jnp.bfloat16)               # (Dh, Dout)
    bp2 = bp.reshape(1, Dout).astype(jnp.float32)  # (1, Dout)

    kernel = functools.partial(_mha_fused_kernel, num_heads=H, head_size=hs)

    return pl.pallas_call(
        kernel,
        out_shape=jax.ShapeDtypeStruct((B, T, Dout), x.dtype),
        grid_spec=pltpu.PrefetchScalarGridSpec(
            num_scalar_prefetch=0,
            grid=(B,),
            in_specs=[
                pl.BlockSpec((1, T, C), lambda b: (b, 0, 0)),      # x (per batch)
                pl.BlockSpec((C, 3 * Dh), lambda b: (0, 0)),       # fused QKV W (resident)
                pl.BlockSpec((Dh, Dout), lambda b: (0, 0)),        # proj W (resident)
                pl.BlockSpec((1, Dout), lambda b: (0, 0)),         # proj bias
            ],
            out_specs=pl.BlockSpec((1, T, Dout), lambda b: (b, 0, 0)),
        ),
        compiler_params=pltpu.CompilerParams(
            dimension_semantics=("parallel",)),    # v7x: batch split over 2 TCs
    )(x, wqkv_t, wp_t, bp2)


# ----------------------------------------------------------------------------
# Pure-JAX f32 reference (mirrors the PyTorch forward in eval mode).
# ----------------------------------------------------------------------------
def reference(x, params):
    wq, wk, wv, wp, bp = params
    B, T, C = x.shape
    H, hs, _ = wq.shape
    outs = []
    for h in range(H):
        q = x @ wq[h].T
        k = x @ wk[h].T
        v = x @ wv[h].T
        s = (q @ jnp.swapaxes(k, -2, -1)) * (hs ** -0.5)
        mask = jnp.tril(jnp.ones((T, T), dtype=bool))
        s = jnp.where(mask, s, -jnp.inf)
        wei = jax.nn.softmax(s, axis=-1)
        outs.append(wei @ v)
    cat = jnp.concatenate(outs, axis=-1)
    return cat @ wp.T + bp


if __name__ == "__main__":
    # Module constants: n_embd = 384, block_size = 128 (T <= block_size).
    n_embd = 384
    B, T = 2, 8
    num_heads, head_size = 2, 32

    key = jax.random.PRNGKey(0)
    kx, kq, kk, kv, kp, kb = jax.random.split(key, 6)

    lim_h = 1.0 / (n_embd ** 0.5)
    wq = jax.random.uniform(kq, (num_heads, head_size, n_embd),
                            jnp.float32, -lim_h, lim_h)
    wk = jax.random.uniform(kk, (num_heads, head_size, n_embd),
                            jnp.float32, -lim_h, lim_h)
    wv = jax.random.uniform(kv, (num_heads, head_size, n_embd),
                            jnp.float32, -lim_h, lim_h)
    d_in = num_heads * head_size
    lim_p = 1.0 / (d_in ** 0.5)
    wp = jax.random.uniform(kp, (n_embd, d_in), jnp.float32, -lim_p, lim_p)
    bp = jax.random.uniform(kb, (n_embd,), jnp.float32, -lim_p, lim_p)

    x = jax.random.normal(kx, (B, T, n_embd), jnp.float32)

    params = (wq, wk, wv, wp, bp)
    out = multi_head_attention(x, params)
    out = jax.block_until_ready(out)

    ref = reference(x, params)
    assert out.shape == (B, T, n_embd)
    # Tolerance loosened vs the all-f32 version: the kernel feeds the MXU bf16
    # operands (f32 accumulation) and uses the EUP approx reciprocal in softmax.
    assert jnp.allclose(out, ref, atol=3e-2, rtol=3e-2), \
        f"max abs err {jnp.max(jnp.abs(out - ref))}"

    print("KERNEL_OK")
</pallas_src>

<mosaic_0001>
module attributes {stable_mosaic.version = 11 : i64} {
  func.func @_mha_fused_kernel(%arg0: i32, %arg1: memref<1x8x384xf32, #tpu.memory_space<vmem>>, %arg2: memref<384x192xbf16, #tpu.memory_space<vmem>>, %arg3: memref<64x384xbf16, #tpu.memory_space<vmem>>, %arg4: memref<1x384xf32, #tpu.memory_space<vmem>>, %arg5: memref<1x8x384xf32, #tpu.memory_space<vmem>>) attributes {dimension_semantics = [#tpu.dimension_semantics<parallel>], iteration_bounds = array<i64: 2>, scalar_prefetch = 0 : i64, scratch_operands = 0 : i64, tpu.core_type = #tpu.core_type<tc>, window_params = [{transform_indices = @transform_0, window_bounds = array<i64: 1, 8, 384>}, {pipeline_mode = #tpu.pipeline_mode<synchronous>, transform_indices = @transform_1, window_bounds = array<i64: 384, 192>}, {pipeline_mode = #tpu.pipeline_mode<synchronous>, transform_indices = @transform_2, window_bounds = array<i64: 64, 384>}, {pipeline_mode = #tpu.pipeline_mode<synchronous>, transform_indices = @transform_3, window_bounds = array<i64: 1, 384>}, {transform_indices = @transform_4, window_bounds = array<i64: 1, 8, 384>}]} {
    %c0 = arith.constant 0 : index
    %c0_0 = arith.constant 0 : index
    %c0_1 = arith.constant 0 : index
    %0 = vector.load %arg1[%c0, %c0_0, %c0_1] : memref<1x8x384xf32, #tpu.memory_space<vmem>>, vector<1x8x384xf32>
    %1 = vector.shape_cast %0 : vector<1x8x384xf32> to vector<8x384xf32>
    %2 = arith.truncf %1 : vector<8x384xf32> to vector<8x384xbf16>
    %c0_2 = arith.constant 0 : index
    %c0_3 = arith.constant 0 : index
    %3 = vector.load %arg2[%c0_2, %c0_3] : memref<384x192xbf16, #tpu.memory_space<vmem>>, vector<384x192xbf16>
    %c0_4 = arith.constant 0 : index
    %c0_5 = arith.constant 0 : index
    %4 = vector.load %arg3[%c0_4, %c0_5] : memref<64x384xbf16, #tpu.memory_space<vmem>>, vector<64x384xbf16>
    %c0_6 = arith.constant 0 : index
    %c0_7 = arith.constant 0 : index
    %5 = vector.load %arg4[%c0_6, %c0_7] : memref<1x384xf32, #tpu.memory_space<vmem>>, vector<1x384xf32>
    %cst = arith.constant dense<0.000000e+00> : vector<8x192xf32>
    %6 = tpu.matmul %2, %3, %cst {dimension_numbers = #tpu.dot_dimension_numbers<[1], [0], [0], [1], [0, 0, 1, 1], [], []>} : vector<8x384xbf16>, vector<384x192xbf16>, vector<8x192xf32> -> vector<8x192xf32>
    %7 = tpu.iota {dimensions = array<i32: 0>} : vector<8x8xi32>
    %8 = tpu.iota {dimensions = array<i32: 1>} : vector<8x8xi32>
    %9 = arith.cmpi sge, %7, %8 : vector<8x8xi32>
    %cst_8 = arith.constant 0.000000e+00 : f32
    %10 = vector.broadcast %cst_8 : f32 to vector<8x384xf32>
    %11 = vector.extract_strided_slice %6 {offsets = [0, 0], sizes = [8, 32], strides = [1, 1]} : vector<8x192xf32> to vector<8x32xf32>
    %12 = arith.truncf %11 : vector<8x32xf32> to vector<8x32xbf16>
    %13 = vector.extract_strided_slice %6 {offsets = [0, 64], sizes = [8, 32], strides = [1, 1]} : vector<8x192xf32> to vector<8x32xf32>
    %14 = arith.truncf %13 : vector<8x32xf32> to vector<8x32xbf16>
    %15 = vector.extract_strided_slice %6 {offsets = [0, 128], sizes = [8, 32], strides = [1, 1]} : vector<8x192xf32> to vector<8x32xf32>
    %16 = arith.truncf %15 : vector<8x32xf32> to vector<8x32xbf16>
    %cst_9 = arith.constant dense<0.000000e+00> : vector<8x8xf32>
    %17 = tpu.matmul %12, %14, %cst_9 {dimension_numbers = #tpu.dot_dimension_numbers<[1], [1], [0], [0], [0, 0, 1, 0], [], []>} : vector<8x32xbf16>, vector<8x32xbf16>, vector<8x8xf32> -> vector<8x8xf32>
    %cst_10 = arith.constant 0.176776692 : f32
    %18 = vector.broadcast %cst_10 : f32 to vector<8x8xf32>
    %19 = arith.mulf %17, %18 : vector<8x8xf32>
    %cst_11 = arith.constant 0xFF800000 : f32
    %20 = vector.broadcast %cst_11 : f32 to vector<8x8xf32>
    %21 = arith.select %9, %19, %20 : vector<8x8xi1>, vector<8x8xf32>
    %cst_12 = arith.constant dense<0xFF800000> : vector<8xf32>
    %22 = vector.multi_reduction <maximumf>, %21, %cst_12 [1] : vector<8x8xf32> to vector<8xf32>
    %23 = vector.shape_cast %22 : vector<8xf32> to vector<8x1xf32>
    %24 = vector.broadcast %23 : vector<8x1xf32> to vector<8x8xf32>
    %25 = arith.subf %21, %24 : vector<8x8xf32>
    %26 = math.exp %25 : vector<8x8xf32>
    %cst_13 = arith.constant dense<0.000000e+00> : vector<8xf32>
    %27 = vector.multi_reduction <add>, %26, %cst_13 [1] : vector<8x8xf32> to vector<8xf32>
    %28 = vector.shape_cast %27 : vector<8xf32> to vector<8x1xf32>
    %29 = tpu.reciprocal %28 {approx = true} : vector<8x1xf32> -> vector<8x1xf32>
    %30 = vector.broadcast %29 : vector<8x1xf32> to vector<8x8xf32>
    %31 = arith.mulf %26, %30 : vector<8x8xf32>
    %32 = arith.truncf %31 : vector<8x8xf32> to vector<8x8xbf16>
    %cst_14 = arith.constant dense<0.000000e+00> : vector<8x32xf32>
    %33 = tpu.matmul %32, %16, %cst_14 {dimension_numbers = #tpu.dot_dimension_numbers<[1], [0], [0], [1], [0, 0, 1, 1], [], []>} : vector<8x8xbf16>, vector<8x32xbf16>, vector<8x32xf32> -> vector<8x32xf32>
    %34 = arith.truncf %33 : vector<8x32xf32> to vector<8x32xbf16>
    %35 = vector.extract_strided_slice %4 {offsets = [0, 0], sizes = [32, 384], strides = [1, 1]} : vector<64x384xbf16> to vector<32x384xbf16>
    %cst_15 = arith.constant dense<0.000000e+00> : vector<8x384xf32>
    %36 = tpu.matmul %34, %35, %cst_15 {dimension_numbers = #tpu.dot_dimension_numbers<[1], [0], [0], [1], [0, 0, 1, 1], [], []>} : vector<8x32xbf16>, vector<32x384xbf16>, vector<8x384xf32> -> vector<8x384xf32>
    %37 = arith.addf %10, %36 : vector<8x384xf32>
    %38 = vector.extract_strided_slice %6 {offsets = [0, 32], sizes = [8, 32], strides = [1, 1]} : vector<8x192xf32> to vector<8x32xf32>
    %39 = arith.truncf %38 : vector<8x32xf32> to vector<8x32xbf16>
    %40 = vector.extract_strided_slice %6 {offsets = [0, 96], sizes = [8, 32], strides = [1, 1]} : vector<8x192xf32> to vector<8x32xf32>
    %41 = arith.truncf %40 : vector<8x32xf32> to vector<8x32xbf16>
    %42 = vector.extract_strided_slice %6 {offsets = [0, 160], sizes = [8, 32], strides = [1, 1]} : vector<8x192xf32> to vector<8x32xf32>
    %43 = arith.truncf %42 : vector<8x32xf32> to vector<8x32xbf16>
    %cst_16 = arith.constant dense<0.000000e+00> : vector<8x8xf32>
    %44 = tpu.matmul %39, %41, %cst_16 {dimension_numbers = #tpu.dot_dimension_numbers<[1], [1], [0], [0], [0, 0, 1, 0], [], []>} : vector<8x32xbf16>, vector<8x32xbf16>, vector<8x8xf32> -> vector<8x8xf32>
    %cst_17 = arith.constant 0.176776692 : f32
    %45 = vector.broadcast %cst_17 : f32 to vector<8x8xf32>
    %46 = arith.mulf %44, %45 : vector<8x8xf32>
    %cst_18 = arith.constant 0xFF800000 : f32
    %47 = vector.broadcast %cst_18 : f32 to vector<8x8xf32>
    %48 = arith.select %9, %46, %47 : vector<8x8xi1>, vector<8x8xf32>
    %cst_19 = arith.constant dense<0xFF800000> : vector<8xf32>
    %49 = vector.multi_reduction <maximumf>, %48, %cst_19 [1] : vector<8x8xf32> to vector<8xf32>
    %50 = vector.shape_cast %49 : vector<8xf32> to vector<8x1xf32>
    %51 = vector.broadcast %50 : vector<8x1xf32> to vector<8x8xf32>
    %52 = arith.subf %48, %51 : vector<8x8xf32>
    %53 = math.exp %52 : vector<8x8xf32>
    %cst_20 = arith.constant dense<0.000000e+00> : vector<8xf32>
    %54 = vector.multi_reduction <add>, %53, %cst_20 [1] : vector<8x8xf32> to vector<8xf32>
    %55 = vector.shape_cast %54 : vector<8xf32> to vector<8x1xf32>
    %56 = tpu.reciprocal %55 {approx = true} : vector<8x1xf32> -> vector<8x1xf32>
    %57 = vector.broadcast %56 : vector<8x1xf32> to vector<8x8xf32>
    %58 = arith.mulf %53, %57 : vector<8x8xf32>
    %59 = arith.truncf %58 : vector<8x8xf32> to vector<8x8xbf16>
    %cst_21 = arith.constant dense<0.000000e+00> : vector<8x32xf32>
    %60 = tpu.matmul %59, %43, %cst_21 {dimension_numbers = #tpu.dot_dimension_numbers<[1], [0], [0], [1], [0, 0, 1, 1], [], []>} : vector<8x8xbf16>, vector<8x32xbf16>, vector<8x32xf32> -> vector<8x32xf32>
    %61 = arith.truncf %60 : vector<8x32xf32> to vector<8x32xbf16>
    %62 = vector.extract_strided_slice %4 {offsets = [32, 0], sizes = [32, 384], strides = [1, 1]} : vector<64x384xbf16> to vector<32x384xbf16>
    %cst_22 = arith.constant dense<0.000000e+00> : vector<8x384xf32>
    %63 = tpu.matmul %61, %62, %cst_22 {dimension_numbers = #tpu.dot_dimension_numbers<[1], [0], [0], [1], [0, 0, 1, 1], [], []>} : vector<8x32xbf16>, vector<32x384xbf16>, vector<8x384xf32> -> vector<8x384xf32>
    %64 = arith.addf %37, %63 : vector<8x384xf32>
    %65 = vector.broadcast %5 : vector<1x384xf32> to vector<8x384xf32>
    %66 = arith.addf %64, %65 : vector<8x384xf32>
    %c0_23 = arith.constant 0 : index
    %c0_24 = arith.constant 0 : index
    %c0_25 = arith.constant 0 : index
    %67 = vector.load %arg5[%c0_23, %c0_24, %c0_25] : memref<1x8x384xf32, #tpu.memory_space<vmem>>, vector<1x8x384xf32>
    %68 = vector.shape_cast %67 : vector<1x8x384xf32> to vector<8x384xf32>
    %69 = vector.shape_cast %66 : vector<8x384xf32> to vector<1x8x384xf32>
    tpu.vector_store %arg5[%c0_23, %c0_24, %c0_25], %69 {strides = array<i32>} : memref<1x8x384xf32, #tpu.memory_space<vmem>>, vector<1x8x384xf32>,
    return
  }
  func.func @transform_0(%arg0: i32) -> (i32, i32, i32) {
    %c0_i32 = arith.constant 0 : i32
    %c0_i32_0 = arith.constant 0 : i32
    %c0_i32_1 = arith.constant 0 : i32
    return %arg0, %c0_i32, %c0_i32_0 : i32, i32, i32
  }
  func.func @transform_1(%arg0: i32) -> (i32, i32) {
    %c0_i32 = arith.constant 0 : i32
    %c0_i32_0 = arith.constant 0 : i32
    %c0_i32_1 = arith.constant 0 : i32
    return %c0_i32, %c0_i32_0 : i32, i32
  }
  func.func @transform_2(%arg0: i32) -> (i32, i32) {
    %c0_i32 = arith.constant 0 : i32
    %c0_i32_0 = arith.constant 0 : i32
    %c0_i32_1 = arith.constant 0 : i32
    return %c0_i32, %c0_i32_0 : i32, i32
  }
  func.func @transform_3(%arg0: i32) -> (i32, i32) {
    %c0_i32 = arith.constant 0 : i32
    %c0_i32_0 = arith.constant 0 : i32
    %c0_i32_1 = arith.constant 0 : i32
    return %c0_i32, %c0_i32_0 : i32, i32
  }
  func.func @transform_4(%arg0: i32) -> (i32, i32, i32) {
    %c0_i32 = arith.constant 0 : i32
    %c0_i32_0 = arith.constant 0 : i32
    %c0_i32_1 = arith.constant 0 : i32
    return %arg0, %c0_i32, %c0_i32_0 : i32, i32, i32
  }
}

</mosaic_0001>

<bundles_post_ra>
// kernel: tpu_custom_call.1
= control target key start
LH: loop header
LB: loop body
LE: loop exit
PB: predicated region body
PF: predicated region fallthrough
CT: control target
= control target key end

     0   :  { %9 = vsyncpa [#allocation3], 0  ;;  %s1870_s0 = inlined_call_operand.vmem [shape: f32[2,8,384], index: 0, kind: input, shape index: {}]   ;;  %s1871_s1 = inlined_call_operand.vmem [shape: bf16[384,192], index: 1, kind: input, shape index: {}]   ;;  %s1872_s2 = inlined_call_operand.vmem [shape: bf16[64,384], index: 2, kind: input, shape index: {}]   ;;  %s1873_s3 = inlined_call_operand.vmem [shape: f32[1,384], index: 3, kind: input, shape index: {}]   ;;  %s1874_s4 = inlined_call_operand.hbm [shape: f32[2,8,384], index: 4, kind: output, shape index: {}]  }
   0x1   :  { %11 = vsyncpa [#allocation3 + $0x1], 0  ;;  %s1520_s15 = smov 0   ;;  %s1522_s16 = smov 0  }
   0x2   :  { %s1524_s17 = smov 0   ;;  %s1526_s18 = smov 0  }
   0x3 LB: > { %s1541_s19 = sadd.s32 4294967295, %s1486_s18   ;;  %s1152_s20 = sadd.s32 4294967294, %s1486_s18   ;;  %s1486_s18 = sphi %s1526_s18, %s1880_s18   ;;  %s1482_s17 = sphi %s1524_s17, %s1879_s17   ;;  %s1478_s16 = sphi %s1522_s16, %s1878_s16   ;;  %s1474_s15 = sphi %s1520_s15, %s1877_s15  }
   0x4   : > { %s1545_s21 = sadd.s32 1, %s1486_s18   ;;  %s113_s22 = sadd.s32 1, %s1482_s17 }
   0x5   : > { %s110_s23 = ssub.s32 %s1486_s18, %s1545_s21  ;;  %p123_p0 = scmp.ne.s32.totalorder %s1482_s17, %s1478_s16 }
   0x6   : > { %p111_p1 = scmp.eq.s32.totalorder %s110_s23, 0  ;;  %p124_p2 = scmp.eq.s32.totalorder %s1541_s19, 1 }
   0x7   : > { %p129_p3 = scmp.ne.s32.totalorder %s1478_s16, %s1474_s15  ;;  %p130_p4 = scmp.eq.s32.totalorder %s1152_s20, 1 }
   0x8   : > { %s1556_s24 = scalar_select %p111_p1, %s1482_s17, %s113_s22  }
   0x9   : > { %p1558_p5 = por %p124_p2, %p123_p0  ;;  %p1562_p6 = por %p130_p4, %p129_p3 }
   0xa   : > { %p1155_p7 = scmp.ge.s32.totalorder %s1486_s18, 1  ;;  %p165_p8 = scmp.lt.s32.totalorder %s1486_s18, 3 }
   0xc   : > { %p166_p9 = pnand %p1155_p7, %p165_p8 }
   0xd   : > { %p191_p10 = scmp.lt.s32.totalorder (!%p166_p9), %s1541_s19, 1  ;;  %s1492_s28 = smov (!%p166_p9), 32  }
   0xe   : > { %169 = sbr.rel (%p166_p9) target bundleno = 1847 (0x737), region = 36  ;;  %s1493_s29 = smov (!%p166_p9), 96  }
   0xf   : > { %s188_s11 = sand.u32 (!%p166_p9), 1, %s1478_s16   ;;  %s1284_s20 = smul.u32 (!%p166_p9), 384, %s1541_s19 }
  0x10   : > { %s1282_s12 = smul.u32 (!%p166_p9), 24, %s188_s11  ;;  %s1494_s6 = smov (!%p166_p9), [#allocation2]  }
  0x11   : > { %s1430_s7 = sshll.u32 (!%p166_p9), %s1494_s6, 4  ;;  %s1431_s7 = int_to_ptr.vmem [resolvable:$false] %s1430_s7 }
  0x12   : > { %s190_s22 = scalar_lea.vmem (!%p166_p9), [#allocation2], %s1282_s12  ;;  %s1432_s8 = scalar_lea.vmem (!%p166_p9), %s1431_s7, 768 }
  0x13   : > { %v1330_v0 = vld [vmem:[%s1871_s1 + $0x74] ss:$8 sps:$4 sm:$0xff]   ;;  %v1332_v1 = vld [vmem:[%s1871_s1 + $0x70] ss:$8 sps:$4 sm:$0xff]   ;;  %v1488_v2 = vmov 0   ;;  %s192_s13 = scalar_select %p191_p10, %s1541_s19, 1 }
  0x14   : > { %581 = vmatprep.mubr.bf16.mxu1 %v1488_v2  ;;  %508 = vmatprep.subr.bf16.mxu0 %v1330_v0  ;;  %v1333_v3 = vld [vmem:[%s1871_s1 + $0x64] ss:$8 sps:$4 sm:$0xff]   ;;  %v1335_v4 = vld [vmem:[%s1871_s1 + $0x60] ss:$8 sps:$4 sm:$0xff]   ;;  %v1336_v5 = vld [vmem:[%s1871_s1 + $0x54] ss:$8 sps:$4 sm:$0xff]  }
  0x15   : > { %509 = vmatpush1.bf16.msra.mxu0 %v1332_v1  ;;  %v1338_v6 = vld [vmem:[%s1871_s1 + $0x50] ss:$8 sps:$4 sm:$0xff]   ;;  %v1339_v7 = vld [vmem:[%s1871_s1 + $0x44] ss:$8 sps:$4 sm:$0xff]   ;;  %v1351_v8 = vld [vmem:[%s1871_s1 + $0x174] ss:$8 sps:$4 sm:$0xff]  }
  0x16   : > { %510 = vmatprep.subr.bf16.mxu0 %v1333_v3  ;;  %v1353_v9 = vld [vmem:[%s1871_s1 + $0x170] ss:$8 sps:$4 sm:$0xff]   ;;  %v1341_v10 = vld [vmem:[%s1871_s1 + $0x40] ss:$8 sps:$4 sm:$0xff]   ;;  %v1342_v11 = vld [vmem:[%s1871_s1 + $0x34] ss:$8 sps:$4 sm:$0xff]   ;;  %549 = vmatprep.subr.bf16.mxu1 %v1351_v8  ;;  %v590_v8 = vlaneseq }
  0x17   : > { %v1357_v12 = vld [vmem:[%s1871_s1 + $0x164] ss:$8 sps:$4 sm:$0xff]   ;;  %550 = vmatpush1.bf16.msra.mxu1 %v1353_v9  ;;  %v1359_v13 = vld [vmem:[%s1871_s1 + $0x160] ss:$8 sps:$4 sm:$0xff]   ;;  %v1344_v14 = vld [vmem:[%s1871_s1 + $0x30] ss:$8 sps:$4 sm:$0xff]  }
  0x18   : > { %551 = vmatprep.subr.bf16.mxu1 %v1357_v12  ;;  %v1363_v15 = vld [vmem:[%s1871_s1 + $0x154] ss:$8 sps:$4 sm:$0xff]   ;;  %v1345_v16 = vld [vmem:[%s1871_s1 + $0x24] ss:$8 sps:$4 sm:$0xff]   ;;  %v1365_v17 = vld [vmem:[%s1871_s1 + $0x150] ss:$8 sps:$4 sm:$0xff]  }
  0x19   : > { %511 = vmatpush1.bf16.msra.mxu0 %v1335_v4  ;;  %v1369_v18 = vld [vmem:[%s1871_s1 + $0x144] ss:$8 sps:$4 sm:$0xff]   ;;  %v1347_v19 = vld [vmem:[%s1871_s1 + $0x20] ss:$8 sps:$4 sm:$0xff]   ;;  %v1348_v20 = vld [vmem:[%s1871_s1 + $0x14] ss:$8 sps:$4 sm:$0xff]  }
  0x1a   : > { %512 = vmatprep.subr.bf16.mxu0 %v1336_v5  ;;  %v1371_v21 = vld [vmem:[%s1871_s1 + $0x140] ss:$8 sps:$4 sm:$0xff]   ;;  %v1375_v22 = vld [vmem:[%s1871_s1 + $0x134] ss:$8 sps:$4 sm:$0xff]   ;;  %v1350_v23 = vld [vmem:[%s1871_s1 + $0x10] ss:$8 sps:$4 sm:$0xff]  }
  0x1b   : > { %552 = vmatpush1.bf16.msra.mxu1 %v1359_v13  ;;  %v1354_v24 = vld [vmem:[%s1871_s1 + $0x4] ss:$8 sps:$4 sm:$0xff]   ;;  %v1377_v25 = vld [vmem:[%s1871_s1 + $0x130] ss:$8 sps:$4 sm:$0xff]   ;;  %v1356_v27 = vld [vmem:[%s1871_s1] ss:$8 sps:$4 sm:$0xff]  }
  0x1c   : > { %553 = vmatprep.subr.bf16.mxu1 %v1363_v15  ;;  %v1381_v26 = vld [vmem:[%s1871_s1 + $0x124] ss:$8 sps:$4 sm:$0xff]   ;;  %s1283_s5 = smul.u32 24, %s192_s13  ;;  %v1360_v28 = vld [vmem:[%s1871_s1 + $0xf4] ss:$8 sps:$4 sm:$0xff]   ;;  %v1489_v59 = vmov 0.0  }
  0x1d   : > { %513 = vmatpush1.bf16.msra.mxu0 %v1338_v6  ;;  %v1383_v29 = vld [vmem:[%s1871_s1 + $0x120] ss:$8 sps:$4 sm:$0xff]   ;;  %v1362_v30 = vld [vmem:[%s1871_s1 + $0xf0] ss:$8 sps:$4 sm:$0xff]   ;;  %v1387_v31 = vld [vmem:[%s1871_s1 + $0x114] ss:$8 sps:$4 sm:$0xff]  }
  0x1e   : > { %514 = vmatprep.subr.bf16.mxu0 %v1339_v7  ;;  %v1366_v32 = vld [vmem:[%s1871_s1 + $0xe4] ss:$8 sps:$4 sm:$0xff]   ;;  %s1670_s27 = scalar_lea.vmem %s1870_s0, %s1283_s5  ;;  %v1389_v33 = vld [vmem:[%s1871_s1 + $0x110] ss:$8 sps:$4 sm:$0xff]   ;;  %v1368_v36 = vld [vmem:[%s1871_s1 + $0xe0] ss:$8 sps:$4 sm:$0xff]  }
  0x1f   : > { %554 = vmatpush1.bf16.msra.mxu1 %v1365_v17  ;;  %v1393_v34 = vld [vmem:[%s1871_s1 + $0x104] ss:$8 sps:$4 sm:$0xff]   ;;  %v1372_v38 = vld [vmem:[%s1871_s1 + $0xd4] ss:$8 sps:$4 sm:$0xff]   ;;  %v1395_v39 = vld [vmem:[%s1871_s1 + $0x100] ss:$8 sps:$4 sm:$0xff]  }
  0x20   : > { %555 = vmatprep.subr.bf16.mxu1 %v1369_v18  ;;  %v198_v35 = vld [vmem:[%s1670_s27 + $0x8] sm:$0xff]  ;;  %v199_v40 = vld [vmem:[%s1670_s27 + $0x10] sm:$0xff]  ;;  %v197_v53 = vld [vmem:[%s1670_s27] sm:$0xff]  ;;  %vm1490_vm0 = vmmov 0   ;;  %s1491_s27 = smov 64   ;;  %vm600_vm1 = vcmask 261120  }
  0x21   : > { %515 = vmatpush1.bf16.msra.mxu0 %v1341_v10  ;;  %v201_v37 = vpack.c.bf16 %v198_v35, %v198_v35  ;;  %v1374_v41 = vld [vmem:[%s1871_s1 + $0xd0] ss:$8 sps:$4 sm:$0xff]   ;;  %v1378_v42 = vld [vmem:[%s1871_s1 + $0xc4] ss:$8 sps:$4 sm:$0xff]   ;;  %v202_v43 = vpack.c.bf16 %v199_v40, %v199_v40  ;;  %v1380_v44 = vld [vmem:[%s1871_s1 + $0xc0] ss:$8 sps:$4 sm:$0xff]   ;;  %v200_v54 = vpack.c.bf16 %v197_v53, %v197_v53 }
  0x22   : > { %516 = vmatprep.subr.bf16.mxu0 %v1342_v11  ;;  %v1384_v45 = vld [vmem:[%s1871_s1 + $0xb4] ss:$8 sps:$4 sm:$0xff]   ;;  %v1386_v46 = vld [vmem:[%s1871_s1 + $0xb0] ss:$8 sps:$4 sm:$0xff]   ;;  %v1390_v47 = vld [vmem:[%s1871_s1 + $0xa4] ss:$8 sps:$4 sm:$0xff]  }
  0x23   : > { %556 = vmatpush1.bf16.msra.mxu1 %v1371_v21  ;;  %540 = vmatprep.mubr.bf16.mxu0 %v201_v37  ;;  %v1392_v48 = vld [vmem:[%s1871_s1 + $0xa0] ss:$8 sps:$4 sm:$0xff]   ;;  %v1396_v49 = vld [vmem:[%s1871_s1 + $0x94] ss:$8 sps:$4 sm:$0xff]   ;;  %v1398_v50 = vld [vmem:[%s1871_s1 + $0x90] ss:$8 sps:$4 sm:$0xff]  }
  0x24   : > { %557 = vmatprep.subr.bf16.mxu1 %v1375_v22  ;;  %v1399_v51 = vld [vmem:[%s1871_s1 + $0x84] ss:$8 sps:$4 sm:$0xff]   ;;  %v1401_v52 = vld [vmem:[%s1871_s1 + $0x80] ss:$8 sps:$4 sm:$0xff]   ;;  %vm665_vm2 = vcmask 1043456   ;;  %v1737_v9 = vshrl.u32 %v590_v8, 7 }
  0x25   : > { %517 = vmatpush1.bf16.msra.mxu0 %v1344_v14  ;;  %v593_v10 = vand.u32 127, %v590_v8  ;;  %vm649_vm4 = vcmask 64512   ;;  %s1093_s23 = sshll.u32 %s190_s22, 4  ;;  %s1079_s19 = scalar_lea.sflag [#allocation3], %s188_s11  ;;  %s1829_s23 = int_to_ptr.vmem [resolvable:$true] %s1093_s23 }
  0x26   : > { %518 = vmatprep.subr.bf16.mxu0 %v1345_v16  ;;  %s1426_s30 = scalar_lea.vmem %s1829_s23, 384  ;;  %p1433_p0 = scmp.lt.s32.totalorder %s1829_s23, %s1431_s7 }
  0x27   : > { %558 = vmatpush1.bf16.msra.mxu1 %v1377_v25  ;;  %vm594_vm3 = vcmp.ge.s32.totalorder %v1737_v9, %v593_v10  ;;  %p1427_p11 = scmp.ne.s32.totalorder %s1829_s23, %s1426_s30  ;;  %p1434_p1 = scmp.lt.s32.totalorder %s1432_s8, %s1426_s30 }
  0x28   : > { %559 = vmatprep.subr.bf16.mxu1 %v1381_v26 }
  0x29   : > { %519 = vmatpush1.bf16.msra.mxu0 %v1347_v19  ;;  %p1428_p12 = pnand %p1427_p11, %p1558_p5  ;;  %p1435_p2 = por %p1434_p1, %p1433_p0 }
  0x2a   : > { %520 = vmatprep.subr.bf16.mxu0 %v1348_v20 }
  0x2b   : > { %560 = vmatpush1.bf16.msra.mxu1 %v1383_v29  ;;  %p1429_p13 = pneg %p1428_p12 }
  0x2c   : > { %561 = vmatprep.subr.bf16.mxu1 %v1387_v31 }
  0x2d   : > { %521 = vmatpush1.bf16.msra.mxu0 %v1350_v23  ;;  %p1436_p3 = pnand %p1435_p2, %p1429_p13 }
  0x2e   : > { %522 = vmatprep.subr.bf16.mxu0 %v1354_v24 }
  0x2f   : > { %562 = vmatpush1.bf16.msra.mxu1 %v1389_v33 }
  0x30   : > { %563 = vmatprep.subr.bf16.mxu1 %v1393_v34 }
  0x31   : > { %523 = vmatpush1.bf16.msra.mxu0 %v1356_v27 }
  0x32   : > { %524 = vmatprep.subr.bf16.mxu0 %v1360_v28 }
  0x33   : > { %564 = vmatpush1.bf16.msra.mxu1 %v1395_v39 }
  0x34   : > { %1242 = vmatprep.subr.bf16.mxu1 %v1489_v59 }
  0x35   : > { %525 = vmatpush2.bf16.msra.mxu0 %v1362_v30 }
  0x36   : > { %526 = vmatprep.subr.bf16.mxu0 %v1366_v32  ;;  %582 = vmatmul.mubr.bf16.vlgmr.msra.gmra.mxu1 %v202_v43 }
  0x37   : > { %1244 = vmatprep.mubr.msk.bf16.mxu1 %vm1490_vm0, %v1489_v59 }
  0x39   : > { %527 = vmatpush2.bf16.msra.mxu0 %v1368_v36 }
  0x3a   : > { %528 = vmatprep.subr.bf16.mxu0 %v1372_v38 }
  0x3d   : > { %529 = vmatpush2.bf16.msra.mxu0 %v1374_v41 }
  0x3e   : > { %530 = vmatprep.subr.bf16.mxu0 %v1378_v42 }
  0x41   : > { %531 = vmatpush2.bf16.msra.mxu0 %v1380_v44 }
  0x42   : > { %532 = vmatprep.subr.bf16.mxu0 %v1384_v45 }
  0x45   : > { %533 = vmatpush2.bf16.msra.mxu0 %v1386_v46  ;;  %v1402_v46 = vld [vmem:[%s1872_s2 + $0x48] ss:$12 sps:$4 sm:$0xff]  }
  0x46   : > { %534 = vmatprep.subr.bf16.mxu0 %v1390_v47  ;;  %v1404_v47 = vld [vmem:[%s1872_s2 + $0x4c] ss:$12 sps:$4 sm:$0xff]  }
  0x49   : > { %535 = vmatpush2.bf16.msra.mxu0 %v1392_v48  ;;  %v1408_v48 = vld [vmem:[%s1872_s2 + $0x34] ss:$12 sps:$4 sm:$0xff]  }
  0x4a   : > { %536 = vmatprep.subr.bf16.mxu0 %v1396_v49  ;;  %v1406_v49 = vld [vmem:[%s1872_s2 + $0x30] ss:$12 sps:$4 sm:$0xff]  }
  0x4d   : > { %537 = vmatpush2.bf16.msra.mxu0 %v1398_v50 }
  0x4e   : > { %538 = vmatprep.subr.bf16.mxu0 %v1399_v51 }
  0x51   : > { %539 = vmatpush2.bf16.msra.mxu0 %v1401_v52 }
  0x52   : > { %871 = vmatprep.subr.bf16.mxu0 %v1404_v47 }
  0x54   : > { %541 = vmatmul.mubr.bf16.vlgmr.msra.gmra.mxu0 %v200_v54 }
  0x55   : > { %891 = vmatprep.mubr.bf16.mxu0 %v1488_v2  ;;  %872 = vmatpush1.bf16.msra.mxu0 %v1402_v46 }
  0x56   : > { %873 = vmatprep.subr.bf16.mxu0 %v1408_v48 }
  0x59   : > { %874 = vmatpush1.bf16.msra.mxu0 %v1406_v49 }
  0xf6   : > { %v583_v55 = vpop.f32.mrf.mxu1 }
  0xf8   : > { %v585_v56 = vpop.f32.mrf.mxu1 }
  0xfa   : > { %v587_v57 = vpop.f32.mrf.mxu1 }
  0xfb   : > { %v1409_v57 = vld [vmem:[%s1872_s2 + $0x38] ss:$12 sps:$4 sm:$0xff]  }
  0xfc   : > { %v588_v58 = vpop.f32.mrf.mxu1 }
  0xfd   : > { %v1412_v58 = vld [vmem:[%s1872_s2 + $0x1c] ss:$12 sps:$4 sm:$0xff]  }
  0xfe   : > { %987 = vmatprep.subr.bf16.mxu0 %v1412_v58 }
 0x114   : > { %v542_v60 = vpop.f32.mrf.mxu0 }
 0x115   : > { %v584_v61 = vadd.f32 %v583_v55, %v542_v60  ;;  %v1405_v55 = vld [vmem:[%s1872_s2 + $0x50] ss:$12 sps:$4 sm:$0xff]  }
 0x116   : > { %v544_v62 = vpop.f32.mrf.mxu0 }
 0x117   : > { %v595_v63 = vpack.c.bf16 %v584_v61, %v584_v61  ;;  %v586_v0 = vadd.f32 %v585_v56, %v544_v62  ;;  %v1410_v61 = vld [vmem:[%s1872_s2 + $0x18] ss:$12 sps:$4 sm:$0xff]   ;;  %v1413_v62 = vld [vmem:[%s1872_s2 + $0x20] ss:$12 sps:$4 sm:$0xff]  }
 0x118   : > { %v546_v1 = vpop.f32.mrf.mxu0 }
 0x119   : > { %598 = vrot.lane.b32.xlu0 %v595_v63, %s1491_s27  ;;  %v1729_v6 = vpack.c.bf16 %v586_v0, %v586_v0  ;;  %v1416_v0 = vld [vmem:[%s1872_s2 + $0x4] ss:$12 sps:$4 sm:$0xff]  }
 0x11a   : > { %v547_v3 = vpop.f32.mrf.mxu0 }
 0x11b   : > { %v667_v7 = vsel %vm665_vm2, %v1729_v6, 0 }
 0x18b   : > { %v599_v4 = vpop.permute.xlu0 %598 }
 0x18c   : > { %v605_v5 = vsel %vm600_vm1, %v599_v4, 0  ;;  %v1414_v4 = vld [vmem:[%s1872_s2] ss:$12 sps:$4 sm:$0xff]  }
 0x18d   : > { %1243 = vmatpush3.bf16.xpose.msra.mxu1 %v605_v5  ;;  %v1417_v5 = vld [vmem:[%s1872_s2 + $0x8] ss:$12 sps:$4 sm:$0xff]  }
 0x18e   : > { %1248 = vmatprep.subr.bf16.mxu1 %v1489_v59 }
 0x194   : > { %1245 = vmatmul.mubr.msk.bf16.vlgmr.msra.gmra.mxu1 %vm600_vm1, %v595_v63 }
 0x195   : > { %1249 = vmatpush3.bf16.msra.mxu1 %v667_v7  ;;  %1250 = vmatprep.mubr.msk.bf16.mxu1 %vm1490_vm0, %v1489_v59 }
 0x196   : > { %1254 = vmatprep.subr.bf16.mxu1 %v1489_v59 }
 0x254   : > { %v641_v11 = vpop.f32.mrf.mxu1 }
 0x255   : > { %v647_v12 = vmul.f32 0.17677669, %v641_v11 }
 0x256   : > { %v1246_v13 = vpop.f32.mrf.mxu1 }
 0x257   : > { %v648_v14 = vsel %vm594_vm3, %v647_v12, -inf }
 0x258   : > { %v644_v15 = vpop.f32.mrf.mxu1  ;;  %v650_v16 = vsel %vm649_vm4, %v648_v14, -inf }
 0x259   : > { %651 = vmax.xlane.f32.xlu0 %v650_v16  ;;  %v267_v15 = vld [vmem:[%s1873_s3] sm:$0x7]  ;;  %v1063_v16 = vsub.s32 1, %v1737_v9 }
 0x25a   : > { %v1247_v17 = vpop.f32.mrf.mxu1 }
 0x2e2   : > { %v652_v18 = vpop.xlane.xlu0 %651 }
 0x2e3   : > { %v653_v19 = vsub.f32 %v648_v14, %v652_v18 }
 0x2e5   : > { %v654_v20 = vmul.f32 1.442695, %v653_v19 }
 0x2e7   : > { %1418 = vpow2.f32 %v654_v20 }
 0x2f4   : > { %v1419_v21 = vpop.eup %1418 }
 0x2f5   : > { %v656_v22 = vsel %vm649_vm4, %v1419_v21, 0.0 }
 0x2f6   : > { %657 = vadd.xlane.f32.xlu1 %v656_v22 }
 0x307   : > { %712 = vrot.lane.b32.xlu1 %v595_v63, %s1492_s28 }
 0x30b   : > { %710 = vrot.lane.b32.xlu1 %v595_v63, %s1493_s29 }
 0x37f   : > { %v658_v23 = vpop.xlane.xlu1 %657 }
 0x380   : > { %1420 = vrcp.f32 %v658_v23 }
 0x383   : > { %v713_v26 = vpop.permute.xlu1 %712 }
 0x384   : > { %v718_v28 = vsel %vm600_vm1, %v713_v26, 0 }
 0x387   : > { %v711_v29 = vpop.permute.xlu1 %710 }
 0x38d   : > { %v1421_v24 = vpop.eup %1420 }
 0x38e   : > { %v660_v25 = vmul.f32 %v1421_v24, %v1419_v21 }
 0x390   : > { %v661_v27 = vpack.c.bf16 %v660_v25, %v660_v25  ;;  %v1064_v25 = vrot.slane %v267_v15, %v1063_v16 }
 0x392   : > { %1251 = vmatmul.mubr.msk.bf16.vlgmr.msra.gmra.mxu1 %vm649_vm4, %v661_v27 }
 0x393   : > { %1255 = vmatpush3.bf16.xpose.msra.mxu1 %v718_v28  ;;  %1256 = vmatprep.mubr.msk.bf16.mxu1 %vm1490_vm0, %v1489_v59 }
 0x394   : > { %1260 = vmatprep.subr.bf16.mxu1 %v1489_v59 }
 0x39a   : > { %1257 = vmatmul.mubr.msk.bf16.vlgmr.msra.gmra.mxu1 %vm600_vm1, %v711_v29 }
 0x39b   : > { %1262 = vmatprep.mubr.msk.bf16.mxu1 %vm1490_vm0, %v1489_v59 }
 0x452   : > { %v1753_v30 = vpop.f32.mrf.mxu1 }
 0x453   : > { %v709_v7 = vpack.c.bf16 %v1753_v30, %v1753_v30 }
 0x454   : > { %v1252_v31 = vpop.f32.mrf.mxu1 }
 0x456   : > { %v706_v32 = vpop.f32.mrf.mxu1 }
 0x458   : > { %v1253_v33 = vpop.f32.mrf.mxu1 }
 0x45a   : > { %v754_v34 = vpop.f32.mrf.mxu1 }
 0x45b   : > { %v760_v35 = vmul.f32 0.17677669, %v754_v34 }
 0x45c   : > { %v1258_v36 = vpop.f32.mrf.mxu1 }
 0x45d   : > { %v761_v37 = vsel %vm594_vm3, %v760_v35, -inf }
 0x45e   : > { %v757_v38 = vpop.f32.mrf.mxu1  ;;  %v762_v39 = vsel %vm649_vm4, %v761_v37, -inf }
 0x45f   : > { %763 = vmax.xlane.f32.xlu1 %v762_v39 }
 0x460   : > { %v1259_v40 = vpop.f32.mrf.mxu1 }
 0x4e8   : > { %v764_v41 = vpop.xlane.xlu1 %763 }
 0x4e9   : > { %v765_v42 = vsub.f32 %v761_v37, %v764_v41 }
 0x4eb   : > { %v766_v43 = vmul.f32 1.442695, %v765_v42 }
 0x4ed   : > { %1422 = vpow2.f32 %v766_v43 }
 0x4fa   : > { %v1423_v44 = vpop.eup %1422 }
 0x4fb   : > { %v768_v45 = vsel %vm649_vm4, %v1423_v44, 0.0 }
 0x4fc   : > { %769 = vadd.xlane.f32.xlu0 %v768_v45 }
 0x512   : > { %775 = vrot.lane.b32.xlu0 %v1729_v6, %s1493_s29  ;;  %s1827_s29 = scalar_lea.hbm %s1874_s4, %s1284_s20 }
 0x585   : > { %v770_v50 = vpop.xlane.xlu0 %769 }
 0x586   : > { %1424 = vrcp.f32 %v770_v50 }
 0x589   : > { %v776_v51 = vpop.permute.xlu0 %775 }
 0x58a   : > { %v781_v52 = vsel %vm665_vm2, %v776_v51, 0 }
 0x58b   : > { %1261 = vmatpush3.bf16.msra.mxu1 %v781_v52 }
 0x58c   : > { %1266 = vmatprep.subr.bf16.mxu1 %v1489_v59 }
 0x593   : > { %v1425_v53 = vpop.eup %1424 }
 0x594   : > { %v772_v54 = vmul.f32 %v1425_v53, %v1423_v44 }
 0x596   : > { %v773_v56 = vpack.c.bf16 %v772_v54, %v772_v54 }
 0x598   : > { %1263 = vmatmul.mubr.msk.bf16.vlgmr.msra.gmra.mxu1 %vm649_vm4, %v773_v56 }
 0x599   : > { %1267 = vmatpush3.bf16.msra.mxu1 %v1405_v55  ;;  %1270 = vmatprep.mubr.msk.bf16.mxu1 %vm1490_vm0, %v1489_v59 }
 0x59a   : > { %1268 = vmatprep.subr.bf16.mxu1 %v1489_v59 }
 0x59d   : > { %1269 = vmatpush3.bf16.msra.mxu1 %v1409_v57 }
 0x59e   : > { %1274 = vmatprep.subr.bf16.mxu1 %v1489_v59 }
 0x658   : > { %v817_v60 = vpop.f32.mrf.mxu1 }
 0x659   : > { %v823_v63 = vpack.c.bf16 %v817_v60, %v817_v60 }
 0x65a   : > { %v1264_v1 = vpop.f32.mrf.mxu1 }
 0x65b   : > { %1215 = vmatmul.mubr.msk.bf16.vlgmr.msra.gmra.mxu0 %vm600_vm1, %v823_v63  ;;  %1271 = vmatmul.mubr.msk.bf16.vlgmr.msra.gmra.mxu1 %vm600_vm1, %v823_v63 }
 0x65c   : > { %v820_v3 = vpop.f32.mrf.mxu1  ;;  %988 = vmatpush1.bf16.msra.mxu0 %v1410_v61  ;;  %1275 = vmatpush3.bf16.msra.mxu1 %v1413_v62 }
 0x65d   : > { %989 = vmatprep.subr.bf16.mxu0 %v1416_v0  ;;  %1276 = vmatprep.subr.bf16.mxu1 %v1489_v59 }
 0x65e   : > { %v1265_v6 = vpop.f32.mrf.mxu1  ;;  %1007 = vmatprep.mubr.bf16.mxu0 %v1488_v2  ;;  %1278 = vmatprep.mubr.msk.bf16.mxu1 %vm1490_vm0, %v1489_v59  ;;  %v1059_v2 = vsub.s32 0, %v1737_v9  ;;  %v1067_v59 = vsub.s32 2, %v1737_v9 }
 0x660   : > { %990 = vmatpush1.bf16.msra.mxu0 %v1414_v4  ;;  %1277 = vmatpush3.bf16.msra.mxu1 %v1417_v5  ;;  %v1060_v19 = vrot.slane %v267_v15, %v1059_v2  ;;  %v1068_v20 = vrot.slane %v267_v15, %v1067_v59 }
 0x663   : > { %1223 = vmatmul.mubr.msk.bf16.vlgmr.msra.gmra.mxu0 %vm600_vm1, %v709_v7  ;;  %1279 = vmatmul.mubr.msk.bf16.vlgmr.msra.gmra.mxu1 %vm600_vm1, %v709_v7 }
 0x71b   : > { %v893_v8 = vpop.f32.mrf.mxu0  ;;  %v934_v10 = vpop.f32.mrf.mxu1 }
 0x71d   : > { %v895_v11 = vpop.f32.mrf.mxu0  ;;  %v1272_v12 = vpop.f32.mrf.mxu1 }
 0x71f   : > { %v897_v13 = vpop.f32.mrf.mxu0  ;;  %v937_v14 = vpop.f32.mrf.mxu1 }
 0x721   : > { %v898_v17 = vpop.f32.mrf.mxu0  ;;  %v1273_v18 = vpop.f32.mrf.mxu1 }
 0x723   : > { %v1009_v21 = vpop.f32.mrf.mxu0  ;;  %v1050_v22 = vpop.f32.mrf.mxu1 }
 0x724   : > { %v1010_v23 = vadd.f32 %v1009_v21, %v893_v8  ;;  %v1051_v24 = vadd.f32 %v1050_v22, %v934_v10 }
 0x725   : > { %v1011_v26 = vpop.f32.mrf.mxu0  ;;  %v1280_v27 = vpop.f32.mrf.mxu1 }
 0x726   : > { %v1072_v28 = vadd.f32 %v1060_v19, %v1010_v23  ;;  %v1074_v29 = vadd.f32 %v1068_v20, %v1051_v24  ;;  %v1012_v30 = vadd.f32 %v1011_v26, %v895_v11 }
 0x727   : > { %v1013_v9 = vpop.f32.mrf.mxu0  ;;  %v1053_v31 = vpop.f32.mrf.mxu1 }
 0x728   : > { %1075 = vst [vmem:[%s190_s22] sm:$0xff] %v1072_v28  ;;  %1077 = vst [vmem:[%s190_s22 + $0x10] sm:$0xff] %v1074_v29  ;;  %v1073_v32 = vadd.f32 %v1064_v25, %v1012_v30 }
 0x729   : > { %v1014_v33 = vpop.f32.mrf.mxu0  ;;  %v1281_v34 = vpop.f32.mrf.mxu1 }
 0x72a   : > { %1076 = vst [vmem:[%s190_s22 + $0x8] sm:$0xff] %v1073_v32 }
 0x72b   : > { %1439 = shalt.err (!%p1436_p3)
}
 0x72c   : > { %s1440_s5 = scalar_lea.hbm %s1827_s29, 384  ;;  %s1444_s11 = scalar_lea.hbm %s1874_s4, 768 }
 0x72d   : > { %p1441_p4 = scmp.ne.s32.totalorder %s1827_s29, %s1440_s5  ;;  %p1445_p9 = scmp.lt.s32.totalorder %s1827_s29, %s1874_s4 }
 0x72e   : > { %p1446_p10 = scmp.lt.s32.totalorder %s1444_s11, %s1440_s5 }
 0x72f   : > { %p1442_p7 = pnand %p1441_p4, %p1558_p5 }
 0x730   : > { %p1447_p11 = por %p1446_p10, %p1445_p9 }
 0x731   : > { %p1443_p8 = pneg %p1442_p7 }
 0x733   : > { %p1448_p12 = pnand %p1447_p11, %p1443_p8 }
 0x735   : > { %1451 = shalt.err (!%p1448_p12)
}
 0x736   : > { %1285 = dma.vmem_to_hbm [thread:$0]  (%p1558_p5), %s1829_s23, 384, %s1827_s29, %s1079_s19  }
 0x737 PF: > { %p1291_p13 = scmp.ge.s32.totalorder %s1486_s18, 2  ;;  %s1105_s13 = sand.u32 1, %s1474_s15  }
 0x738   : > { %s1106_s20 = scalar_lea.sflag [#allocation3], %s1105_s13 }
 0x739   : > { %p1288_p0 = pnand %p1291_p13, %p1562_p6 }
 0x73b   : > { %p1289_p1 = pneg %p1288_p0 }
 0x73d   : > { %1469 = dma.done.wait (%p1289_p1), %s1106_s20, 384  }
 0x73e   : > { %1471 = vsyncadd (%p1289_p1), %s1106_s20, 4294966912  ;;  %p14_p2 = scmp.ge.s32.totalorder %s1545_s21, 4   ;;  %s1877_s15 = smov %s1478_s16 }
 0x73f   : > { %s1878_s16 = smov %s1482_s17  ;;  %s1879_s17 = smov %s1556_s24 }
 0x740   : > { %s1880_s18 = smov %s1545_s21  ;;  %16 = sbr.rel (!%p14_p2) target bundleno = 3 (0x3), region = 71 }
 0x745   :  { %1111 = vsyncpa [#allocation3], 1 }
 0x746   :  { %1113 = vsyncpa [#allocation3 + $0x1], 1 }

</bundles_post_ra>
